<compile_context>
chip_gen: v5e
topology: v5e:2x2
jax: 0.10.0
libtpu: 0.0.40
codegen_flags: <defaults>
</compile_context>

<pallas_src>
import functools

import jax
import jax.numpy as jnp
from jax.experimental import pallas as pl
from jax.experimental.pallas import tpu as pltpu

SPARSITY_COEFF = 0.0004   # Matryoshka.sparsity_coeff
N_PREFIXES = 10           # Matryoshka.n_prefixes


# --------------------------------------------------------------------------
# Kernels
# --------------------------------------------------------------------------
def _mse_kernel(x_ref, pred_ref, mse_ref):
    """Sum of squared errors, accumulated across the batch-chunk grid axis.

    x_ref    : [1, P*D]   resident (x[p, d] at lane p*D + d)
    pred_ref : [bb, P*D]  prefix_preds chunk (batch rows -> sublanes)
    mse_ref  : [1, 1]     output accumulator (resident across the whole grid)
    """
    @pl.when(pl.program_id(0) == 0)
    def _():
        mse_ref[...] = jnp.zeros_like(mse_ref)

    x = x_ref[...].astype(jnp.float32)
    pred = pred_ref[...].astype(jnp.float32)
    d = pred - x                                   # broadcast over batch rows
    mse_ref[...] += jnp.sum(d * d)                 # full reduce once per block


def _l0l1_kernel(fx_ref, l0_ref, l1_ref):
    """Column sums of f_x (and of f_x > 0) over (batch, prefix) rows.

    fx_ref : [tr, ts]   f_x block (rows -> sublanes, d_sae tile -> lanes)
    l0_ref : [1, ts]    per-S-tile output accumulator (resident across rows)
    l1_ref : [1, ts]    per-S-tile output accumulator (resident across rows)
    """
    @pl.when(pl.program_id(1) == 0)
    def _():
        l0_ref[...] = jnp.zeros_like(l0_ref)
        l1_ref[...] = jnp.zeros_like(l1_ref)

    fx = fx_ref[...].astype(jnp.float32)           # single load feeds l0 and l1
    l1_ref[...] += jnp.sum(fx, axis=0, keepdims=True)
    l0_ref[...] += jnp.sum((fx > 0).astype(jnp.float32), axis=0, keepdims=True)


# --------------------------------------------------------------------------
# Tiling heuristics (trace-time Python)
# --------------------------------------------------------------------------
def _largest_mult8_divisor(n: int, cap: int) -> int:
    cap = min(cap, n)
    best, t = 0, 8
    while t <= cap:
        if n % t == 0:
            best = t
        t += 8
    return best


def _choose_s_tile(S: int, cap: int = 2048) -> int:
    """Multiple-of-128 divisor of S (or S itself), preferring >=2 tiles for megacore."""
    if S % 128 != 0:
        return S
    best, ts = 128, 128
    while ts <= min(S, cap):
        if S % ts == 0:
            best = ts
        ts += 128
    if best == S and S >= 256 and (S // 2) % 128 == 0:
        best = S // 2            # give the "parallel" S axis >= 2 tiles (v7x 2 TCs)
    return best


def _choose_row_block(rows: int, width: int, itemsize: int,
                      block_bytes: int = 4 << 20) -> tuple[int, int]:
    """(row_block, row_pad): ~block_bytes per buffer, multiple of 8 or full extent."""
    cap = max(8, (block_bytes // max(1, width * itemsize)) // 8 * 8)
    tr = _largest_mult8_divisor(rows, cap)
    if tr:
        return tr, 0
    if rows * width * itemsize <= 2 * block_bytes:
        return rows, 0           # full-extent block, single row step
    tr = cap                     # rare fallback: pad rows (costs one HBM copy)
    return tr, (-rows) % tr


# --------------------------------------------------------------------------
# Wrapper
# --------------------------------------------------------------------------
@functools.partial(jax.jit, static_argnames=("sparsity_coeff",))
def matryoshka_objective(x, f_x, prefix_preds, *, sparsity_coeff=SPARSITY_COEFF):
    B, D = x.shape
    Bf, P, S = f_x.shape
    assert prefix_preds.shape == (B, P, D) and Bf == B
    assert B == P, "literal torch forward requires batch == n_prefixes"

    # ---------------- MSE: sum_{b,p,d} (prefix_preds[b,p,d] - x[p,d])^2 -------------
    PD = P * D
    x_flat = x.reshape(1, PD)                       # lane-dense broadcast operand
    pred_flat = prefix_preds.reshape(B, PD)
    bb, pad_b = _choose_row_block(B, PD, jnp.dtype(prefix_preds.dtype).itemsize)
    if pad_b:                                       # pad with x rows -> diff == 0
        pred_flat = jnp.concatenate(
            [pred_flat,
             jnp.broadcast_to(x_flat.astype(pred_flat.dtype), (pad_b, PD))], axis=0)
    n_b = (B + pad_b) // bb

    mse_sum = pl.pallas_call(
        _mse_kernel,
        grid=(n_b,),
        in_specs=[
            pl.BlockSpec((1, PD), lambda c: (0, 0)),     # x: full, resident
            pl.BlockSpec((bb, PD), lambda c: (c, 0)),    # prefix_preds chunk
        ],
        out_specs=pl.BlockSpec((1, 1), lambda c: (0, 0)),
        out_shape=jax.ShapeDtypeStruct((1, 1), jnp.float32),
        compiler_params=pltpu.CompilerParams(
            dimension_semantics=("arbitrary",),          # accumulation axis
            vmem_limit_bytes=32 << 20,
        ),
    )(x_flat, pred_flat)

    # ---------------- L0 / L1: column sums of f_x over (batch, prefix) rows ---------
    R = B * P
    fx2d = f_x.reshape(R, S)
    ts = _choose_s_tile(S)
    tr, pad_r = _choose_row_block(R, ts, jnp.dtype(f_x.dtype).itemsize)
    if pad_r:                                       # zero rows are neutral for l0/l1
        fx2d = jnp.pad(fx2d, ((0, pad_r), (0, 0)))
    n_s, n_r = S // ts, (R + pad_r) // tr

    l0_sum, l1_sum = pl.pallas_call(
        _l0l1_kernel,
        grid=(n_s, n_r),
        in_specs=[pl.BlockSpec((tr, ts), lambda s, r: (r, s))],
        out_specs=[
            pl.BlockSpec((1, ts), lambda s, r: (0, s)),
            pl.BlockSpec((1, ts), lambda s, r: (0, s)),
        ],
        out_shape=[
            jax.ShapeDtypeStruct((1, S), jnp.float32),
            jax.ShapeDtypeStruct((1, S), jnp.float32),
        ],
        compiler_params=pltpu.CompilerParams(
            dimension_semantics=("parallel", "arbitrary"),  # S tiles megacore-shard;
            vmem_limit_bytes=32 << 20,                      # rows stay sequential
        ),
    )(fx2d)

    # Cheap final scaling (means) in plain JAX.
    mse = mse_sum[0, 0] / (B * P)            # .sum(dim=-1).mean()
    l0 = l0_sum[0] / B                       # sum(axis=1).mean(axis=0) -> [d_sae]
    l1 = l1_sum[0] / B                       # sum(axis=1).mean(axis=0) -> [d_sae]
    sparsity = sparsity_coeff * l1
    return {"mse": mse, "sparsity": sparsity, "l0": l0, "l1": l1,
            "loss": mse + sparsity}


if __name__ == "__main__":
    key = jax.random.PRNGKey(0)
    B = P = N_PREFIXES   # batch must equal n_prefixes (literal torch broadcast)
    D, S = 32, 64        # d_model, d_sae

    kx, kf, kp = jax.random.split(key, 3)
    x = jax.random.normal(kx, (B, D), dtype=jnp.float32)
    f_x = jax.nn.relu(jax.random.normal(kf, (B, P, S), dtype=jnp.float32))
    prefix_preds = jax.random.normal(kp, (B, P, D), dtype=jnp.float32)

    out = matryoshka_objective(x, f_x, prefix_preds)
    jax.block_until_ready(out)

    # Plain-JAX reference of the literal torch forward (with the `upper` scaling).
    u = jnp.max(jnp.abs(x))
    mse_ref = jnp.mean(
        jnp.sum(((prefix_preds / u - x[None] / u) ** 2) * u * u, axis=-1))
    l0_ref = jnp.mean(jnp.sum((f_x > 0).astype(jnp.float32), axis=1), axis=0)
    l1_ref = jnp.mean(jnp.sum(f_x, axis=1), axis=0)
    sparsity_ref = SPARSITY_COEFF * l1_ref

    assert jnp.allclose(out["mse"], mse_ref, rtol=1e-5, atol=1e-5)
    assert jnp.allclose(out["l0"], l0_ref, rtol=1e-5, atol=1e-5)
    assert jnp.allclose(out["l1"], l1_ref, rtol=1e-5, atol=1e-5)
    assert jnp.allclose(out["sparsity"], sparsity_ref, rtol=1e-5, atol=1e-6)
    assert jnp.allclose(out["loss"], mse_ref + sparsity_ref, rtol=1e-5, atol=1e-5)

    print("KERNEL_OK")
</pallas_src>

<mosaic_0001>
module attributes {stable_mosaic.version = 11 : i64} {
  func.func @_l0l1_kernel(%arg0: i32, %arg1: i32, %arg2: memref<100x64xf32, #tpu.memory_space<vmem>>, %arg3: memref<1x64xf32, #tpu.memory_space<vmem>>, %arg4: memref<1x64xf32, #tpu.memory_space<vmem>>) attributes {dimension_semantics = [#tpu.dimension_semantics<parallel>, #tpu.dimension_semantics<arbitrary>], iteration_bounds = array<i64: 1, 1>, scalar_prefetch = 0 : i64, scratch_operands = 0 : i64, tpu.core_type = #tpu.core_type<tc>, window_params = [{transform_indices = @transform_0, window_bounds = array<i64: 100, 64>}, {transform_indices = @transform_1, window_bounds = array<i64: 1, 64>}, {transform_indices = @transform_2, window_bounds = array<i64: 1, 64>}]} {
    %c0_i32 = arith.constant 0 : i32
    %0 = arith.cmpi eq, %arg1, %c0_i32 : i32
    %1 = arith.extui %0 : i1 to i32
    %c0_i32_0 = arith.constant 0 : i32
    %2 = arith.cmpi ne, %1, %c0_i32_0 : i32
    scf.if %2 {
      %cst_12 = arith.constant 0.000000e+00 : f32
      %18 = vector.broadcast %cst_12 : f32 to vector<1x64xf32>
      %c0_13 = arith.constant 0 : index
      %c0_14 = arith.constant 0 : index
      %19 = vector.load %arg3[%c0_13, %c0_14] : memref<1x64xf32, #tpu.memory_space<vmem>>, vector<1x64xf32>
      tpu.vector_store %arg3[%c0_13, %c0_14], %18 {strides = array<i32>} : memref<1x64xf32, #tpu.memory_space<vmem>>, vector<1x64xf32>,
      %cst_15 = arith.constant 0.000000e+00 : f32
      %20 = vector.broadcast %cst_15 : f32 to vector<1x64xf32>
      %c0_16 = arith.constant 0 : index
      %c0_17 = arith.constant 0 : index
      %21 = vector.load %arg4[%c0_16, %c0_17] : memref<1x64xf32, #tpu.memory_space<vmem>>, vector<1x64xf32>
      tpu.vector_store %arg4[%c0_16, %c0_17], %20 {strides = array<i32>} : memref<1x64xf32, #tpu.memory_space<vmem>>, vector<1x64xf32>,
    } else {
    }
    %c0 = arith.constant 0 : index
    %c0_1 = arith.constant 0 : index
    %3 = vector.load %arg2[%c0, %c0_1] : memref<100x64xf32, #tpu.memory_space<vmem>>, vector<100x64xf32>
    %c0_2 = arith.constant 0 : index
    %c0_3 = arith.constant 0 : index
    %4 = vector.load %arg4[%c0_2, %c0_3] : memref<1x64xf32, #tpu.memory_space<vmem>>, vector<1x64xf32>
    %cst = arith.constant dense<0.000000e+00> : vector<64xf32>
    %5 = vector.multi_reduction <add>, %3, %cst [0] : vector<100x64xf32> to vector<64xf32>
    %6 = vector.shape_cast %5 : vector<64xf32> to vector<1x64xf32>
    %7 = arith.addf %4, %6 : vector<1x64xf32>
    %c0_4 = arith.constant 0 : index
    %c0_5 = arith.constant 0 : index
    %8 = vector.load %arg4[%c0_4, %c0_5] : memref<1x64xf32, #tpu.memory_space<vmem>>, vector<1x64xf32>
    tpu.vector_store %arg4[%c0_4, %c0_5], %7 {strides = array<i32>} : memref<1x64xf32, #tpu.memory_space<vmem>>, vector<1x64xf32>,
    %c0_6 = arith.constant 0 : index
    %c0_7 = arith.constant 0 : index
    %9 = vector.load %arg3[%c0_6, %c0_7] : memref<1x64xf32, #tpu.memory_space<vmem>>, vector<1x64xf32>
    %cst_8 = arith.constant 0.000000e+00 : f32
    %10 = vector.broadcast %cst_8 : f32 to vector<100x64xf32>
    %11 = arith.cmpf ogt, %3, %10 : vector<100x64xf32>
    %12 = arith.extui %11 : vector<100x64xi1> to vector<100x64xi32>
    %13 = arith.sitofp %12 : vector<100x64xi32> to vector<100x64xf32>
    %cst_9 = arith.constant dense<0.000000e+00> : vector<64xf32>
    %14 = vector.multi_reduction <add>, %13, %cst_9 [0] : vector<100x64xf32> to vector<64xf32>
    %15 = vector.shape_cast %14 : vector<64xf32> to vector<1x64xf32>
    %16 = arith.addf %9, %15 : vector<1x64xf32>
    %c0_10 = arith.constant 0 : index
    %c0_11 = arith.constant 0 : index
    %17 = vector.load %arg3[%c0_10, %c0_11] : memref<1x64xf32, #tpu.memory_space<vmem>>, vector<1x64xf32>
    tpu.vector_store %arg3[%c0_10, %c0_11], %16 {strides = array<i32>} : memref<1x64xf32, #tpu.memory_space<vmem>>, vector<1x64xf32>,
    return
  }
  func.func @transform_0(%arg0: i32, %arg1: i32) -> (i32, i32) {
    %c0_i32 = arith.constant 0 : i32
    return %arg1, %arg0 : i32, i32
  }
  func.func @transform_1(%arg0: i32, %arg1: i32) -> (i32, i32) {
    %c0_i32 = arith.constant 0 : i32
    %c0_i32_0 = arith.constant 0 : i32
    return %c0_i32, %arg0 : i32, i32
  }
  func.func @transform_2(%arg0: i32, %arg1: i32) -> (i32, i32) {
    %c0_i32 = arith.constant 0 : i32
    %c0_i32_0 = arith.constant 0 : i32
    return %c0_i32, %arg0 : i32, i32
  }
}

module attributes {stable_mosaic.version = 11 : i64} {
  func.func @_mse_kernel(%arg0: i32, %arg1: memref<1x320xf32, #tpu.memory_space<vmem>>, %arg2: memref<10x320xf32, #tpu.memory_space<vmem>>, %arg3: memref<1x1xf32, #tpu.memory_space<vmem>>) attributes {dimension_semantics = [#tpu.dimension_semantics<arbitrary>], iteration_bounds = array<i64: 1>, scalar_prefetch = 0 : i64, scratch_operands = 0 : i64, tpu.core_type = #tpu.core_type<tc>, window_params = [{pipeline_mode = #tpu.pipeline_mode<synchronous>, transform_indices = @transform_0, window_bounds = array<i64: 1, 320>}, {transform_indices = @transform_1, window_bounds = array<i64: 10, 320>}, {pipeline_mode = #tpu.pipeline_mode<synchronous>, transform_indices = @transform_2, window_bounds = array<i64: 1, 1>}]} {
    %c0_i32 = arith.constant 0 : i32
    %0 = arith.cmpi eq, %arg0, %c0_i32 : i32
    %1 = arith.extui %0 : i1 to i32
    %c0_i32_0 = arith.constant 0 : i32
    %2 = arith.cmpi ne, %1, %c0_i32_0 : i32
    scf.if %2 {
      %cst_8 = arith.constant 0.000000e+00 : f32
      %16 = vector.broadcast %cst_8 : f32 to vector<1x1xf32>
      %c0_9 = arith.constant 0 : index
      %c0_10 = arith.constant 0 : index
      %17 = vector.load %arg3[%c0_9, %c0_10] : memref<1x1xf32, #tpu.memory_space<vmem>>, vector<1x1xf32>
      tpu.vector_store %arg3[%c0_9, %c0_10], %16 {strides = array<i32>} : memref<1x1xf32, #tpu.memory_space<vmem>>, vector<1x1xf32>,
    } else {
    }
    %c0 = arith.constant 0 : index
    %c0_1 = arith.constant 0 : index
    %3 = vector.load %arg1[%c0, %c0_1] : memref<1x320xf32, #tpu.memory_space<vmem>>, vector<1x320xf32>
    %c0_2 = arith.constant 0 : index
    %c0_3 = arith.constant 0 : index
    %4 = vector.load %arg2[%c0_2, %c0_3] : memref<10x320xf32, #tpu.memory_space<vmem>>, vector<10x320xf32>
    %5 = vector.broadcast %3 : vector<1x320xf32> to vector<10x320xf32>
    %6 = arith.subf %4, %5 : vector<10x320xf32>
    %c0_4 = arith.constant 0 : index
    %c0_5 = arith.constant 0 : index
    %7 = vector.load %arg3[%c0_4, %c0_5] : memref<1x1xf32, #tpu.memory_space<vmem>>, vector<1x1xf32>
    %8 = arith.mulf %6, %6 : vector<10x320xf32>
    %9 = vector.shape_cast %8 : vector<10x320xf32> to vector<1x10x320xf32>
    %cst = arith.constant dense<0.000000e+00> : vector<1xf32>
    %10 = vector.multi_reduction <add>, %9, %cst [1, 2] : vector<1x10x320xf32> to vector<1xf32>
    %11 = vector.shape_cast %10 : vector<1xf32> to vector<1x1x1xf32>
    %12 = vector.extract %11[0, 0, 0] : f32 from vector<1x1x1xf32>
    %13 = vector.broadcast %12 : f32 to vector<1x1xf32>
    %14 = arith.addf %7, %13 : vector<1x1xf32>
    %c0_6 = arith.constant 0 : index
    %c0_7 = arith.constant 0 : index
    %15 = vector.load %arg3[%c0_6, %c0_7] : memref<1x1xf32, #tpu.memory_space<vmem>>, vector<1x1xf32>
    tpu.vector_store %arg3[%c0_6, %c0_7], %14 {strides = array<i32>} : memref<1x1xf32, #tpu.memory_space<vmem>>, vector<1x1xf32>,
    return
  }
  func.func @transform_0(%arg0: i32) -> (i32, i32) {
    %c0_i32 = arith.constant 0 : i32
    %c0_i32_0 = arith.constant 0 : i32
    %c0_i32_1 = arith.constant 0 : i32
    return %c0_i32, %c0_i32_0 : i32, i32
  }
  func.func @transform_1(%arg0: i32) -> (i32, i32) {
    %c0_i32 = arith.constant 0 : i32
    %c0_i32_0 = arith.constant 0 : i32
    return %arg0, %c0_i32 : i32, i32
  }
  func.func @transform_2(%arg0: i32) -> (i32, i32) {
    %c0_i32 = arith.constant 0 : i32
    %c0_i32_0 = arith.constant 0 : i32
    %c0_i32_1 = arith.constant 0 : i32
    return %c0_i32, %c0_i32_0 : i32, i32
  }
}

</mosaic_0001>

<bundles_post_ra>
// kernel: matryoshka_objective.3
= control target key start
LH: loop header
LB: loop body
LE: loop exit
PB: predicated region body
PF: predicated region fallthrough
CT: control target
= control target key end

     0   :  { %vm14_vm0 = vcmask 516096   ;;  %v162_v0 = vmov 0.0   ;;  %vm31_vm4 = vcmask 523264   ;;  %vm55_vm15 = vcmask 519168   ;;  %s278_s0 = inlined_call_operand.vmem [shape: f32[100,64], index: 0, kind: input, shape index: {}]   ;;  %s279_s1 = inlined_call_operand.vmem [shape: f32[1,64], index: 1, kind: output, shape index: {0}]   ;;  %s280_s2 = inlined_call_operand.vmem [shape: f32[1,64], index: 2, kind: output, shape index: {1}]  }
   0x1   :  { %15 = vst.msk [vmem:[%s279_s1] sm:$0x1] %vm14_vm0, %v162_v0  ;;  %v17_v1 = vld [vmem:[%s278_s0] sm:$0xff]  ;;  %v18_v2 = vld [vmem:[%s278_s0 + $0x8] sm:$0xff]  ;;  %v19_v3 = vld [vmem:[%s278_s0 + $0x10] sm:$0xff] }
   0x2   :  { %v20_v4 = vld [vmem:[%s278_s0 + $0x18] sm:$0xff]  ;;  %vm68_vm1 = vcmp.gt.f32.partialorder %v17_v1, 0.0  ;;  %vm69_vm2 = vcmp.gt.f32.partialorder %v18_v2, 0.0  ;;  %vm70_vm3 = vcmp.gt.f32.partialorder %v19_v3, 0.0  ;;  %v21_v5 = vld [vmem:[%s278_s0 + $0x20] sm:$0xff]  ;;  %v22_v6 = vld [vmem:[%s278_s0 + $0x28] sm:$0xff] }
   0x3   :  { %vm71_vm5 = vcmp.gt.f32.partialorder %v20_v4, 0.0  ;;  %v148_v7 = vsel %vm68_vm1, 1.0, %v162_v0  ;;  %v149_v8 = vsel %vm69_vm2, 1.0, %v162_v0  ;;  %v150_v9 = vsel %vm70_vm3, 1.0, %v162_v0  ;;  %16 = vst.msk [vmem:[%s280_s2] sm:$0x1] %vm14_vm0, %v162_v0 }
   0x4   :  { %vm72_vm6 = vcmp.gt.f32.partialorder %v21_v5, 0.0  ;;  %v23_v10 = vld [vmem:[%s278_s0 + $0x30] sm:$0xff]  ;;  %v151_v11 = vsel %vm71_vm5, 1.0, %v162_v0  ;;  %v24_v12 = vld [vmem:[%s278_s0 + $0x38] sm:$0xff]  ;;  %vm73_vm7 = vcmp.gt.f32.partialorder %v22_v6, 0.0  ;;  %v107_v13 = vsel %vm31_vm4, %v148_v7, 0.0 }
   0x5   :  { %v108_v14 = vsel %vm31_vm4, %v149_v8, 0.0  ;;  %v110_v15 = vsel %vm31_vm4, %v150_v9, 0.0  ;;  %v152_v16 = vsel %vm72_vm6, 1.0, %v162_v0  ;;  %vm74_vm8 = vcmp.gt.f32.partialorder %v23_v10, 0.0  ;;  %v25_v19 = vld [vmem:[%s278_s0 + $0x40] sm:$0xff]  ;;  %v26_v26 = vld [vmem:[%s278_s0 + $0x48] sm:$0xff] }
   0x6   :  { %v109_v17 = vadd.f32 %v108_v14, %v107_v13  ;;  %v112_v18 = vsel %vm31_vm4, %v151_v11, 0.0  ;;  %vm75_vm9 = vcmp.gt.f32.partialorder %v24_v12, 0.0  ;;  %v153_v20 = vsel %vm73_vm7, 1.0, %v162_v0  ;;  %v27_v32 = vld [vmem:[%s278_s0 + $0x50] sm:$0xff]  ;;  %v28_v38 = vld [vmem:[%s278_s0 + $0x58] sm:$0xff] }
   0x7   :  { %v114_v22 = vsel %vm31_vm4, %v152_v16, 0.0  ;;  %v32_v23 = vsel %vm31_vm4, %v17_v1, 0.0  ;;  %v33_v24 = vsel %vm31_vm4, %v18_v2, 0.0  ;;  %v35_v25 = vsel %vm31_vm4, %v19_v3, 0.0  ;;  %v29_v44 = vld [vmem:[%s278_s0 + $0x60] sm:$0xf] }
   0x8   :  { %v111_v21 = vadd.f32 %v110_v15, %v109_v17  ;;  %v154_v27 = vsel %vm74_vm8, 1.0, %v162_v0  ;;  %v34_v29 = vadd.f32 %v33_v24, %v32_v23  ;;  %vm76_vm10 = vcmp.gt.f32.partialorder %v25_v19, 0.0 }
   0x9   :  { %v116_v30 = vsel %vm31_vm4, %v153_v20, 0.0  ;;  %v37_v31 = vsel %vm31_vm4, %v20_v4, 0.0  ;;  %v155_v33 = vsel %vm75_vm9, 1.0, %v162_v0  ;;  %vm77_vm11 = vcmp.gt.f32.partialorder %v26_v26, 0.0 }
   0xa   :  { %v113_v28 = vadd.f32 %v112_v18, %v111_v21  ;;  %v36_v35 = vadd.f32 %v35_v25, %v34_v29  ;;  %v118_v36 = vsel %vm31_vm4, %v154_v27, 0.0  ;;  %v39_v37 = vsel %vm31_vm4, %v21_v5, 0.0  ;;  %v67_v21 = vld [vmem:[%s279_s1] sm:$0x1] }
   0xb   :  { %v156_v39 = vsel %vm76_vm10, 1.0, %v162_v0  ;;  %vm78_vm12 = vcmp.gt.f32.partialorder %v27_v32, 0.0  ;;  %v120_v42 = vsel %vm31_vm4, %v155_v33, 0.0  ;;  %v41_v43 = vsel %vm31_vm4, %v22_v6, 0.0 }
   0xc   :  { %v115_v34 = vadd.f32 %v114_v22, %v113_v28  ;;  %v38_v41 = vadd.f32 %v37_v31, %v36_v35  ;;  %v157_v45 = vsel %vm77_vm11, 1.0, %v162_v0  ;;  %vm79_vm13 = vcmp.gt.f32.partialorder %v28_v38, 0.0 }
   0xd   :  { %v122_v48 = vsel %vm31_vm4, %v156_v39, 0.0  ;;  %v43_v49 = vsel %vm31_vm4, %v23_v10, 0.0  ;;  %v158_v50 = vsel %vm78_vm12, 1.0, %v162_v0  ;;  %vm80_vm14 = vcmp.gt.f32.partialorder %v29_v44, 0.0 }
   0xe   :  { %v117_v40 = vadd.f32 %v116_v30, %v115_v34  ;;  %v40_v47 = vadd.f32 %v39_v37, %v38_v41  ;;  %v124_v53 = vsel %vm31_vm4, %v157_v45, 0.0  ;;  %v45_v54 = vsel %vm31_vm4, %v24_v12, 0.0 }
   0xf   :  { %v159_v55 = vsel %vm79_vm13, 1.0, %v162_v0  ;;  %v126_v58 = vsel %vm31_vm4, %v158_v50, 0.0  ;;  %v47_v59 = vsel %vm31_vm4, %v25_v19, 0.0  ;;  %v160_v60 = vsel %vm80_vm14, 1.0, %v162_v0 }
  0x10   :  { %v119_v46 = vadd.f32 %v118_v36, %v117_v40  ;;  %v42_v52 = vadd.f32 %v41_v43, %v40_v47  ;;  %v128_v63 = vsel %vm31_vm4, %v159_v55, 0.0  ;;  %v49_v1 = vsel %vm31_vm4, %v26_v26, 0.0  ;;  %v30_v26 = vld [vmem:[%s280_s2] sm:$0x1] }
  0x11   :  { %v130_v4 = vsel %vm55_vm15, %v160_v60, 0.0  ;;  %v51_v5 = vsel %vm31_vm4, %v27_v32, 0.0  ;;  %v53_v8 = vsel %vm31_vm4, %v28_v38, 0.0  ;;  %v56_v11 = vsel %vm55_vm15, %v29_v44, 0.0 }
  0x12   :  { %v121_v51 = vadd.f32 %v120_v42, %v119_v46  ;;  %v44_v57 = vadd.f32 %v43_v49, %v42_v52 }
  0x14   :  { %v123_v56 = vadd.f32 %v122_v48, %v121_v51  ;;  %v46_v62 = vadd.f32 %v45_v54, %v44_v57 }
  0x16   :  { %v125_v61 = vadd.f32 %v124_v53, %v123_v56  ;;  %v48_v3 = vadd.f32 %v47_v59, %v46_v62 }
  0x18   :  { %v127_v2 = vadd.f32 %v126_v58, %v125_v61  ;;  %v50_v7 = vadd.f32 %v49_v1, %v48_v3 }
  0x1a   :  { %v129_v6 = vadd.f32 %v128_v63, %v127_v2  ;;  %v52_v10 = vadd.f32 %v51_v5, %v50_v7 }
  0x1c   :  { %v131_v9 = vadd.f32 %v130_v4, %v129_v6  ;;  %v54_v0 = vadd.f32 %v53_v8, %v52_v10 }
  0x1e   :  { %v132_v12 = vrot.slane %v131_v9, 4  ;;  %v57_v14 = vadd.f32 %v56_v11, %v54_v0 }
  0x20   :  { %v133_v13 = vadd.f32 %v132_v12, %v131_v9  ;;  %v58_v16 = vrot.slane %v57_v14, 4 }
  0x22   :  { %v134_v15 = vrot.slane %v133_v13, 2  ;;  %v59_v18 = vadd.f32 %v58_v16, %v57_v14 }
  0x24   :  { %v135_v17 = vadd.f32 %v134_v15, %v133_v13  ;;  %v60_v20 = vrot.slane %v59_v18, 2 }
  0x26   :  { %v136_v19 = vrot.slane %v135_v17, 1  ;;  %v61_v23 = vadd.f32 %v60_v20, %v59_v18 }
  0x28   :  { %v137_v22 = vadd.f32 %v136_v19, %v135_v17  ;;  %v62_v25 = vrot.slane %v61_v23, 1 }
  0x2a   :  { %v138_v24 = vadd.f32 %v137_v22, %v67_v21  ;;  %v63_v27 = vadd.f32 %v62_v25, %v61_v23 }
  0x2c   :  { %139 = vst.msk [vmem:[%s279_s1] sm:$0x1] %vm14_vm0, %v138_v24  ;;  %v64_v28 = vadd.f32 %v63_v27, %v30_v26 }
  0x2e   :  { %66 = vst.msk [vmem:[%s280_s2] sm:$0x1] %vm14_vm0, %v64_v28 }

// kernel: matryoshka_objective.2
= control target key start
LH: loop header
LB: loop body
LE: loop exit
PB: predicated region body
PF: predicated region fallthrough
CT: control target
= control target key end

     0   :  { %s159_s0 = inlined_call_operand.vmem [shape: f32[1,320], index: 0, kind: input, shape index: {}]   ;;  %s160_s1 = inlined_call_operand.vmem [shape: f32[10,320], index: 1, kind: input, shape index: {}]   ;;  %s161_s2 = inlined_call_operand.hbm [shape: f32[1,1], index: 2, kind: output, shape index: {}]  }
   0x1   :  { %v18_v0 = vld [vmem:[%s159_s0] sm:$0x7]  ;;  %v20_v2 = vld [vmem:[%s160_s1 + $0x8] sm:$0xff]  ;;  %v21_v3 = vld [vmem:[%s160_s1 + $0x10] sm:$0xff] }
   0x2   :  { %v19_v1 = vld [vmem:[%s160_s1] sm:$0xff]  ;;  %v22_v4 = vld [vmem:[%s160_s1 + $0x18] sm:$0x3]  ;;  %v26_v6 = vperm.slane %v18_v0, 0  ;;  %v24_v7 = vld [vmem:[%s160_s1 + $0x28] sm:$0x3] }
   0x3   :  { %v23_v5 = vld [vmem:[%s160_s1 + $0x20] sm:$0x3]  ;;  %v27_v8 = vperm.slane %v18_v0, 1  ;;  %v28_v9 = vperm.slane %v18_v0, 2 }
   0x4   :  { %v32_v10 = vsub.f32 %v19_v1, %v26_v6  ;;  %v35_v11 = vsub.f32 %v22_v4, %v26_v6 }
   0x5   :  { %7 = vsyncpa [#allocation3], 0  ;;  %v33_v12 = vsub.f32 %v20_v2, %v27_v8  ;;  %v34_v13 = vsub.f32 %v21_v3, %v28_v9  ;;  %v36_v14 = vsub.f32 %v23_v5, %v27_v8  ;;  %v37_v15 = vsub.f32 %v24_v7, %v28_v9  ;;  %s117_s1 = smov [#allocation2]   ;;  %s77_s25 = sshll.u32 %s161_s2, 4  ;;  %s78_s25 = int_to_ptr.hbm [resolvable:$true] %s77_s25 }
   0x6   :  { %v39_v16 = vmul.f32 %v32_v10, %v32_v10  ;;  %v42_v17 = vmul.f32 %v35_v11, %v35_v11  ;;  %vm46_vm0 = vcmask 523264   ;;  %vm49_vm1 = vcmask 1041408   ;;  %s75_s22 = sshll.u32 %s117_s1, 4  ;;  %s76_s22 = int_to_ptr.vmem [resolvable:$true] %s75_s22 }
   0x7   :  { %v40_v18 = vmul.f32 %v33_v12, %v33_v12  ;;  %v41_v19 = vmul.f32 %v34_v13, %v34_v13  ;;  %v43_v20 = vmul.f32 %v36_v14, %v36_v14  ;;  %v44_v23 = vmul.f32 %v37_v15, %v37_v15 }
   0x8   :  { %v50_v24 = vsel %vm49_vm1, %v42_v17, 0.0  ;;  %vm54_vm2 = vcmask 517120   ;;  %vm16_vm3 = vcmask 0   ;;  %v116_v31 = vmov 0.0  }
   0x9   :  { %v45_v21 = vadd.f32 %v40_v18, %v39_v16  ;;  %v47_v22 = vsel %vm46_vm0, %v41_v19, 0.0  ;;  %v52_v26 = vsel %vm49_vm1, %v43_v20, 0.0  ;;  %v55_v28 = vsel %vm54_vm2, %v44_v23, 0.0  ;;  %17 = vst.msk [vmem:[#allocation2] sm:$0x1] %vm16_vm3, %v116_v31 }
   0xb   :  { %v48_v25 = vadd.f32 %v47_v22, %v45_v21 }
   0xd   :  { %v51_v27 = vadd.f32 %v50_v24, %v48_v25 }
   0xf   :  { %v53_v29 = vadd.f32 %v52_v26, %v51_v27 }
  0x10   :  { %v38_v39 = vld [vmem:[#allocation2] sm:$0x1] }
  0x11   :  { %v56_v30 = vadd.f32 %v55_v28, %v53_v29 }
  0x13   :  { %57 = vadd.xlane.f32.xlu0 %v56_v30 }
  0x86   :  { %v58_v32 = vpop.xlane.xlu0 %57 }
  0x87   :  { %v59_v33 = vrot.slane %v58_v32, 4 }
  0x89   :  { %v60_v34 = vadd.f32 %v59_v33, %v58_v32 }
  0x8b   :  { %v61_v35 = vrot.slane %v60_v34, 2 }
  0x8d   :  { %v62_v36 = vadd.f32 %v61_v35, %v60_v34 }
  0x8f   :  { %v63_v37 = vrot.slane %v62_v36, 1 }
  0x91   :  { %v64_v38 = vadd.f32 %v63_v37, %v62_v36 }
  0x93   :  { %86 = vpush %v64_v38 }
  0xc4   :  { %s87_s26 = spop %86 }
  0xc5   :  { %v66_v40 = vstv %s87_s26 }
  0xc6   :  { %v67_v41 = vadd.f32 %v66_v40, %v38_v39 }
  0xc8   :  { %69 = vst.msk [vmem:[#allocation2] sm:$0x1] %vm16_vm3, %v67_v41 }
  0xc9   :  { %80 = dma.vmem_to_hbm [thread:$0]  %s76_s22, 16, %s78_s25, [#allocation3]  }
  0xca   :  { %114 = dma.done.wait [#allocation3], 16  }
  0xcb   :  { %115 = vsyncadd [#allocation3], 4294967280 }
  0xcc   :  { %85 = vsyncpa [#allocation3], 1 }

</bundles_post_ra>
